<compile_context>
chip_gen: v7x
topology: tpu7x:2x2x1
jax: 0.10.0
libtpu: 0.0.40
codegen_flags: <defaults>
</compile_context>

<pallas_src>
import jax
import jax.numpy as jnp
from jax.experimental import pallas as pl
from jax.experimental.pallas import tpu as pltpu

LANE = 128     # vreg lane width (last dim)
SUBLANE = 8    # vreg sublane width (second-to-last dim)


def _round_up(n: int, m: int) -> int:
    return ((n + m - 1) // m) * m


def _pad_to(a, shape):
    pads = [(0, t - s) for s, t in zip(a.shape, shape)]
    return jnp.pad(a, pads)


# ----------------------------------------------------------------------------
# Kernel
# ----------------------------------------------------------------------------
def qnet_kernel(x_ref, w1_ref, b1_ref, w2_ref, b2_ref, o_ref):
    # Layer 1: bf16 MXU operands, f32 accumulation (no unconditional f32 cast
    # of the inputs -- the native dtype feeds the MXU directly).
    h = jnp.dot(x_ref[...], w1_ref[...], preferred_element_type=jnp.float32)
    # Bias add + ReLU kept in f32 (v5e VPU has no bf16 ALU; cheap everywhere).
    h = jnp.maximum(h + b1_ref[...].astype(jnp.float32), 0.0)
    # Layer 2: cast activations back to the weight dtype for the MXU,
    # accumulate in f32.
    out = jnp.dot(h.astype(w2_ref.dtype), w2_ref[...],
                  preferred_element_type=jnp.float32)
    o_ref[...] = (out + b2_ref[...].astype(jnp.float32)).astype(o_ref.dtype)


# ----------------------------------------------------------------------------
# Parameter preparation (done once): pad to lane-dense shapes, cast to bf16.
# ----------------------------------------------------------------------------
def prepare_qnet_params(w1, b1, w2, b2, param_dtype=jnp.bfloat16):
    x_dim, hidden = w1.shape
    out_dim = w2.shape[1]
    x_dim_p = _round_up(x_dim, LANE)
    hidden_p = _round_up(hidden, LANE)
    out_p = _round_up(out_dim, LANE)
    return dict(
        w1=_pad_to(w1, (x_dim_p, hidden_p)).astype(param_dtype),
        b1=_pad_to(b1.reshape(1, -1), (1, hidden_p)).astype(param_dtype),
        w2=_pad_to(w2, (hidden_p, out_p)).astype(param_dtype),
        b2=_pad_to(b2.reshape(1, -1), (1, out_p)).astype(param_dtype),
        x_dim=x_dim,
        out_dim=out_dim,
    )


# ----------------------------------------------------------------------------
# Wrapper
# ----------------------------------------------------------------------------
def qnet_forward(x_prime, params, *, tile_b=128,
                 act_dtype=jnp.bfloat16, out_dtype=jnp.float32):
    B, x_dim = x_prime.shape
    assert x_dim == params["x_dim"]
    w1, b1, w2, b2 = params["w1"], params["b1"], params["w2"], params["b2"]
    x_dim_p, hidden_p = w1.shape
    out_p = w2.shape[1]
    out_dim = params["out_dim"]

    # Batch tile: multiple of the 8-sublane width, capped at 128 (one MXU tile).
    tile_b = min(tile_b, _round_up(B, SUBLANE))
    B_p = _round_up(B, tile_b)

    # Pad the activation stream to (B_p, x_dim_p) and cast to the MXU dtype.
    x_p = _pad_to(x_prime, (B_p, x_dim_p)).astype(act_dtype)

    grid = (B_p // tile_b,)

    # Advisory cost for XLA's scheduler around this tiny custom call.
    itemsize = lambda dt: jnp.dtype(dt).itemsize
    flops = 2 * B_p * (x_dim_p * hidden_p + hidden_p * out_p)
    bytes_accessed = (
        B_p * x_dim_p * itemsize(act_dtype)
        + w1.size * itemsize(w1.dtype) + b1.size * itemsize(b1.dtype)
        + w2.size * itemsize(w2.dtype) + b2.size * itemsize(b2.dtype)
        + B_p * out_p * itemsize(out_dtype)
    )

    out_padded = pl.pallas_call(
        qnet_kernel,
        out_shape=jax.ShapeDtypeStruct((B_p, out_p), out_dtype),
        grid_spec=pltpu.PrefetchScalarGridSpec(
            num_scalar_prefetch=0,
            grid=grid,
            in_specs=[
                # Activation stream: tiled over batch, auto double-buffered.
                pl.BlockSpec((tile_b, x_dim_p), lambda i: (i, 0)),
                # Weights / biases: same block every step -> VMEM-resident.
                pl.BlockSpec((x_dim_p, hidden_p), lambda i: (0, 0)),
                pl.BlockSpec((1, hidden_p), lambda i: (0, 0)),
                pl.BlockSpec((hidden_p, out_p), lambda i: (0, 0)),
                pl.BlockSpec((1, out_p), lambda i: (0, 0)),
            ],
            out_specs=pl.BlockSpec((tile_b, out_p), lambda i: (i, 0)),
        ),
        compiler_params=pltpu.CompilerParams(
            # Batch axis is independent -> shardable across v7x's two TCs.
            dimension_semantics=("parallel",),
            # Explicit VMEM budget (fits v7x's 64 MiB physical with headroom).
            vmem_limit_bytes=32 * 1024 * 1024,
        ),
        cost_estimate=pl.CostEstimate(
            flops=flops, transcendentals=0, bytes_accessed=bytes_accessed),
    )(x_p, w1, b1, w2, b2)

    # Slice padded rows/cols back to the logical output.
    return out_padded[:B, :out_dim]


# ----------------------------------------------------------------------------
# Synthetic init + pure-JAX reference (same bf16 operand rounding as kernel)
# ----------------------------------------------------------------------------
def init_qnet_params(key, x_dim, z_dim, hidden_dim, dtype=jnp.float32):
    """Deterministic synthetic init matching nn.Linear shapes:
       Linear(x_dim, hidden_dim) then Linear(hidden_dim, 2*z_dim).
       (Stored as (in, out); PyTorch stores (out, in) and transposes.)"""
    k1, k2, k3, k4 = jax.random.split(key, 4)
    w1 = jax.random.normal(k1, (x_dim, hidden_dim), dtype) * 0.1
    b1 = jax.random.normal(k2, (1, hidden_dim), dtype) * 0.1
    w2 = jax.random.normal(k3, (hidden_dim, z_dim * 2), dtype) * 0.1
    b2 = jax.random.normal(k4, (1, z_dim * 2), dtype) * 0.1
    return w1, b1, w2, b2


def qnet_reference(x, w1, b1, w2, b2):
    """Pure-JAX reference that emulates the kernel's numerics:
       bf16 MXU operands, f32 accumulation, f32 epilogue."""
    r = lambda a: a.astype(jnp.bfloat16).astype(jnp.float32)
    h = jnp.maximum(jnp.dot(r(x), r(w1)) + r(b1), 0.0)
    return jnp.dot(r(h), r(w2)) + r(b2)


if __name__ == "__main__":
    # Small shapes consistent with the module: batch=8, x_dim=16, hidden=32, z_dim=4.
    B, X_DIM, Z_DIM, HIDDEN = 8, 16, 4, 32

    key = jax.random.PRNGKey(0)
    kx, kp = jax.random.split(key)
    x_prime = jax.random.normal(kx, (B, X_DIM), jnp.float32)
    w1, b1, w2, b2 = init_qnet_params(kp, X_DIM, Z_DIM, HIDDEN)

    # One-time parameter prep (pad to lane width, cast to bf16).
    params = prepare_qnet_params(w1, b1, w2, b2)

    out = qnet_forward(x_prime, params)
    out = jax.block_until_ready(out)

    ref = qnet_reference(x_prime, w1, b1, w2, b2)
    assert out.shape == (B, 2 * Z_DIM), out.shape
    assert jnp.allclose(out, ref, atol=1e-4, rtol=1e-4), "mismatch vs reference"

    print("KERNEL_OK")
</pallas_src>

<mosaic_0001>
module attributes {stable_mosaic.version = 11 : i64} {
  func.func @qnet_kernel(%arg0: i32, %arg1: memref<8x128xbf16, #tpu.memory_space<vmem>>, %arg2: memref<128x128xbf16, #tpu.memory_space<vmem>>, %arg3: memref<1x128xbf16, #tpu.memory_space<vmem>>, %arg4: memref<128x128xbf16, #tpu.memory_space<vmem>>, %arg5: memref<1x128xbf16, #tpu.memory_space<vmem>>, %arg6: memref<8x128xf32, #tpu.memory_space<vmem>>) attributes {dimension_semantics = [#tpu.dimension_semantics<parallel>], iteration_bounds = array<i64: 1>, scalar_prefetch = 0 : i64, scratch_operands = 0 : i64, tpu.core_type = #tpu.core_type<tc>, window_params = [{transform_indices = @transform_0, window_bounds = array<i64: 8, 128>}, {pipeline_mode = #tpu.pipeline_mode<synchronous>, transform_indices = @transform_1, window_bounds = array<i64: 128, 128>}, {pipeline_mode = #tpu.pipeline_mode<synchronous>, transform_indices = @transform_2, window_bounds = array<i64: 1, 128>}, {pipeline_mode = #tpu.pipeline_mode<synchronous>, transform_indices = @transform_3, window_bounds = array<i64: 128, 128>}, {pipeline_mode = #tpu.pipeline_mode<synchronous>, transform_indices = @transform_4, window_bounds = array<i64: 1, 128>}, {transform_indices = @transform_5, window_bounds = array<i64: 8, 128>}]} {
    %c0 = arith.constant 0 : index
    %c0_0 = arith.constant 0 : index
    %0 = vector.load %arg1[%c0, %c0_0] : memref<8x128xbf16, #tpu.memory_space<vmem>>, vector<8x128xbf16>
    %c0_1 = arith.constant 0 : index
    %c0_2 = arith.constant 0 : index
    %1 = vector.load %arg2[%c0_1, %c0_2] : memref<128x128xbf16, #tpu.memory_space<vmem>>, vector<128x128xbf16>
    %cst = arith.constant dense<0.000000e+00> : vector<8x128xf32>
    %2 = tpu.matmul %0, %1, %cst {dimension_numbers = #tpu.dot_dimension_numbers<[1], [0], [0], [1], [0, 0, 1, 1], [], []>} : vector<8x128xbf16>, vector<128x128xbf16>, vector<8x128xf32> -> vector<8x128xf32>
    %c0_3 = arith.constant 0 : index
    %c0_4 = arith.constant 0 : index
    %3 = vector.load %arg3[%c0_3, %c0_4] : memref<1x128xbf16, #tpu.memory_space<vmem>>, vector<1x128xbf16>
    %4 = arith.extf %3 : vector<1x128xbf16> to vector<1x128xf32>
    %5 = vector.broadcast %4 : vector<1x128xf32> to vector<8x128xf32>
    %6 = arith.addf %2, %5 : vector<8x128xf32>
    %cst_5 = arith.constant 0.000000e+00 : f32
    %7 = vector.broadcast %cst_5 : f32 to vector<8x128xf32>
    %8 = arith.maximumf %6, %7 : vector<8x128xf32>
    %9 = arith.truncf %8 : vector<8x128xf32> to vector<8x128xbf16>
    %c0_6 = arith.constant 0 : index
    %c0_7 = arith.constant 0 : index
    %10 = vector.load %arg4[%c0_6, %c0_7] : memref<128x128xbf16, #tpu.memory_space<vmem>>, vector<128x128xbf16>
    %cst_8 = arith.constant dense<0.000000e+00> : vector<8x128xf32>
    %11 = tpu.matmul %9, %10, %cst_8 {dimension_numbers = #tpu.dot_dimension_numbers<[1], [0], [0], [1], [0, 0, 1, 1], [], []>} : vector<8x128xbf16>, vector<128x128xbf16>, vector<8x128xf32> -> vector<8x128xf32>
    %c0_9 = arith.constant 0 : index
    %c0_10 = arith.constant 0 : index
    %12 = vector.load %arg5[%c0_9, %c0_10] : memref<1x128xbf16, #tpu.memory_space<vmem>>, vector<1x128xbf16>
    %13 = arith.extf %12 : vector<1x128xbf16> to vector<1x128xf32>
    %14 = vector.broadcast %13 : vector<1x128xf32> to vector<8x128xf32>
    %15 = arith.addf %11, %14 : vector<8x128xf32>
    %c0_11 = arith.constant 0 : index
    %c0_12 = arith.constant 0 : index
    %16 = vector.load %arg6[%c0_11, %c0_12] : memref<8x128xf32, #tpu.memory_space<vmem>>, vector<8x128xf32>
    tpu.vector_store %arg6[%c0_11, %c0_12], %15 {strides = array<i32>} : memref<8x128xf32, #tpu.memory_space<vmem>>, vector<8x128xf32>,
    return
  }
  func.func @transform_0(%arg0: i32) -> (i32, i32) {
    %c0_i32 = arith.constant 0 : i32
    %c0_i32_0 = arith.constant 0 : i32
    return %arg0, %c0_i32 : i32, i32
  }
  func.func @transform_1(%arg0: i32) -> (i32, i32) {
    %c0_i32 = arith.constant 0 : i32
    %c0_i32_0 = arith.constant 0 : i32
    %c0_i32_1 = arith.constant 0 : i32
    return %c0_i32, %c0_i32_0 : i32, i32
  }
  func.func @transform_2(%arg0: i32) -> (i32, i32) {
    %c0_i32 = arith.constant 0 : i32
    %c0_i32_0 = arith.constant 0 : i32
    %c0_i32_1 = arith.constant 0 : i32
    return %c0_i32, %c0_i32_0 : i32, i32
  }
  func.func @transform_3(%arg0: i32) -> (i32, i32) {
    %c0_i32 = arith.constant 0 : i32
    %c0_i32_0 = arith.constant 0 : i32
    %c0_i32_1 = arith.constant 0 : i32
    return %c0_i32, %c0_i32_0 : i32, i32
  }
  func.func @transform_4(%arg0: i32) -> (i32, i32) {
    %c0_i32 = arith.constant 0 : i32
    %c0_i32_0 = arith.constant 0 : i32
    %c0_i32_1 = arith.constant 0 : i32
    return %c0_i32, %c0_i32_0 : i32, i32
  }
  func.func @transform_5(%arg0: i32) -> (i32, i32) {
    %c0_i32 = arith.constant 0 : i32
    %c0_i32_0 = arith.constant 0 : i32
    return %arg0, %c0_i32 : i32, i32
  }
}

</mosaic_0001>

<bundles_post_ra>
// kernel: tpu_custom_call.1
= control target key start
LH: loop header
LB: loop body
LE: loop exit
PB: predicated region body
PF: predicated region fallthrough
CT: control target
= control target key end

     0   :  { %10 = vsyncpa [#allocation3], 0  ;;  %s591_s0 = inlined_call_operand.hbm [shape: bf16[8,128], index: 0, kind: input, shape index: {}]   ;;  %s592_s1 = inlined_call_operand.hbm [shape: bf16[128,128], index: 1, kind: input, shape index: {}]   ;;  %s593_s2 = inlined_call_operand.vmem [shape: bf16[1,128], index: 2, kind: input, shape index: {}]   ;;  %s594_s3 = inlined_call_operand.hbm [shape: bf16[128,128], index: 3, kind: input, shape index: {}]   ;;  %s595_s4 = inlined_call_operand.vmem [shape: bf16[1,128], index: 4, kind: input, shape index: {}]   ;;  %s596_s5 = inlined_call_operand.hbm [shape: f32[8,128], index: 5, kind: output, shape index: {}]  }
   0x1   :  { %11 = vsyncpa [#allocation6], 0 }
   0x2   :  { %12 = vsyncpa [#allocation4], 0  ;;  %s493_s18 = smov [#allocation5]   ;;  %s399_s22 = scalar_lea.hbm %s592_s1, 1024 }
   0x3   :  { %s28_s19 = sshll.u32 %s493_s18, 4  ;;  %p400_p0 = scmp.ne.s32.totalorder %s592_s1, %s399_s22  ;;  %s29_s19 = int_to_ptr.vmem [resolvable:$true] %s28_s19 }
   0x4   :  { %p403_p1 = scmp.lt.u32.totalorder %s399_s22, %s592_s1 }
   0x6   :  { %p405_p2 = pnand %p403_p1, %p400_p0 }
   0x8   :  { %408 = shalt.err (!%p405_p2)
}
   0x9   :  { %s409_s27 = scalar_lea.vmem %s29_s19, 1024  ;;  %p414_p4 = scmp.lt.s32.totalorder %s29_s19, %s29_s19 }
   0xa   :  { %p410_p3 = scmp.ne.s32.totalorder %s29_s19, %s409_s27  ;;  %p415_p5 = scmp.lt.s32.totalorder %s409_s27, %s409_s27 }
   0xc   :  { %p416_p6 = por %p415_p5, %p414_p4 }
   0xe   :  { %p417_p7 = pnand %p416_p6, %p410_p3 }
  0x10   :  { %420 = shalt.err (!%p417_p7)
}
  0x11   :  { %s494_s28 = smov 64   ;;  %s495_s29 = smov 4  }
  0x12   :  { %34 = dma.hbm_to_vmem [thread:$0]  %s592_s1, 1024, %s29_s19, [#allocation6], %s494_s28, %s494_s28, %s495_s29  }
  0x13   :  { %s496_s7 = smov [#allocation2]   ;;  %s497_s9 = smov [#allocation7]  }
  0x14   :  { %s19_s8 = sshll.u32 %s496_s7, 4  ;;  %s42_s10 = sshll.u32 %s497_s9, 4  ;;  %s20_s8 = int_to_ptr.vmem [resolvable:$true] %s19_s8  ;;  %s43_s10 = int_to_ptr.vmem [resolvable:$true] %s42_s10 }
  0x15   :  { %s421_s13 = scalar_lea.hbm %s591_s0, 64 }
  0x16   :  { %p422_p8 = scmp.ne.s32.totalorder %s591_s0, %s421_s13  ;;  %p425_p9 = scmp.lt.u32.totalorder %s421_s13, %s591_s0 }
  0x18   :  { %p427_p10 = pnand %p425_p9, %p422_p8 }
  0x1a   :  { %430 = shalt.err (!%p427_p10)
}
  0x1b   :  { %s431_s1 = scalar_lea.vmem %s20_s8, 64  ;;  %p436_p12 = scmp.lt.s32.totalorder %s20_s8, %s20_s8 }
  0x1c   :  { %p432_p11 = scmp.ne.s32.totalorder %s20_s8, %s431_s1  ;;  %p437_p13 = scmp.lt.s32.totalorder %s431_s1, %s431_s1 }
  0x1e   :  { %p438_p0 = por %p437_p13, %p436_p12 }
  0x20   :  { %p439_p1 = pnand %p438_p0, %p432_p11 }
  0x22   :  { %442 = shalt.err (!%p439_p1)
}
  0x23   :  { %22 = dma.hbm_to_vmem [thread:$0]  %s591_s0, 64, %s20_s8, [#allocation3]  }
  0x24   :  { %s443_s22 = scalar_lea.hbm %s594_s3, 1024 }
  0x25   :  { %p444_p2 = scmp.ne.s32.totalorder %s594_s3, %s443_s22  ;;  %p447_p3 = scmp.lt.u32.totalorder %s443_s22, %s594_s3 }
  0x27   :  { %p449_p4 = pnand %p447_p3, %p444_p2 }
  0x29   :  { %452 = shalt.err (!%p449_p4)
}
  0x2a   :  { %s453_s27 = scalar_lea.vmem %s43_s10, 1024  ;;  %p458_p6 = scmp.lt.s32.totalorder %s43_s10, %s43_s10 }
  0x2b   :  { %p454_p5 = scmp.ne.s32.totalorder %s43_s10, %s453_s27  ;;  %p459_p7 = scmp.lt.s32.totalorder %s453_s27, %s453_s27 }
  0x2d   :  { %p460_p8 = por %p459_p7, %p458_p6 }
  0x2f   :  { %p461_p9 = pnand %p460_p8, %p454_p5 }
  0x31   :  { %464 = shalt.err (!%p461_p9)
}
  0x32   :  { %48 = dma.hbm_to_vmem [thread:$0]  %s594_s3, 1024, %s43_s10, [#allocation6], %s494_s28, %s494_s28, %s495_s29  }
  0x33   :  { %487 = dma.done.wait [#allocation3], 64  }
  0x34   :  { %488 = vsyncadd [#allocation3], 4294967232 }
  0x35   :  { %489 = dma.done.wait [#allocation6], 2048  }
  0x36   :  { %490 = vsyncadd [#allocation6], 4294965248  ;;  %v498_v0 = vmov 0.0   ;;  %vm499_vm0 = vmmov 0   ;;  %v383_v1 = vld [vmem:[#allocation5] sm:$0xff]   ;;  %v384_v2 = vld [vmem:[#allocation5 + $0x8] sm:$0xff]   ;;  %v80_v18 = vlaneseq }
  0x37   :  { %335 = vmatprep.subr.bf16.mxu0 %v498_v0  ;;  %351 = vmatprep.mubr.msk.bf16.mxu0 %vm499_vm0, %v498_v0  ;;  %v385_v3 = vld [vmem:[#allocation5 + $0x10] sm:$0xff]   ;;  %v391_v4 = vld [vmem:[#allocation7] sm:$0xff]   ;;  %v386_v5 = vld [vmem:[#allocation5 + $0x18] sm:$0xff]   ;;  %s500_s7 = smov [#allocation8]  }
  0x38   :  { %355 = vmatprep.subr.bf16.mxu1 %v498_v0  ;;  %371 = vmatprep.mubr.msk.bf16.mxu1 %vm499_vm0, %v498_v0  ;;  %v392_v6 = vld [vmem:[#allocation7 + $0x8] sm:$0xff]   ;;  %v387_v7 = vld [vmem:[#allocation5 + $0x20] sm:$0xff]   ;;  %v393_v8 = vld [vmem:[#allocation7 + $0x10] sm:$0xff]   ;;  %v81_v19 = vshrl.u32 %v80_v18, 7  ;;  %s291_s8 = sshll.u32 %s500_s7, 4  ;;  %s292_s8 = int_to_ptr.vmem [resolvable:$true] %s291_s8 }
  0x39   :  { %336 = vmatpush3.bf16.msra.mxu0 %v383_v1  ;;  %356 = vmatpush3.bf16.msra.mxu1 %v391_v4  ;;  %v388_v9 = vld [vmem:[#allocation5 + $0x28] sm:$0xff]   ;;  %v394_v10 = vld [vmem:[#allocation7 + $0x18] sm:$0xff]   ;;  %v389_v11 = vld [vmem:[#allocation5 + $0x30] sm:$0xff]   ;;  %p470_p11 = scmp.lt.s32.totalorder %s292_s8, %s292_s8 }
  0x3a   :  { %337 = vmatprep.subr.bf16.mxu0 %v498_v0  ;;  %357 = vmatprep.subr.bf16.mxu1 %v498_v0  ;;  %v395_v12 = vld [vmem:[#allocation7 + $0x20] sm:$0xff]   ;;  %v390_v13 = vld [vmem:[#allocation5 + $0x38] sm:$0xff]   ;;  %v396_v14 = vld [vmem:[#allocation7 + $0x28] sm:$0xff]   ;;  %v82_v22 = vsub.s32 0, %v81_v19 }
  0x3b   :  { %v61_v15 = vld [vmem:[#allocation2] sm:$0xf]  ;;  %v397_v16 = vld [vmem:[#allocation7 + $0x30] sm:$0xff]  }
  0x3c   :  { %v398_v17 = vld [vmem:[#allocation7 + $0x38] sm:$0xff]  }
  0x3d   :  { %338 = vmatpush3.bf16.msra.mxu0 %v384_v2  ;;  %358 = vmatpush3.bf16.msra.mxu1 %v392_v6  ;;  %v78_v20 = vld [vmem:[%s593_s2] sm:$0x1]  ;;  %s465_s2 = scalar_lea.vmem %s292_s8, 128 }
  0x3e   :  { %339 = vmatprep.subr.bf16.mxu0 %v498_v0  ;;  %359 = vmatprep.subr.bf16.mxu1 %v498_v0  ;;  %v79_v21 = vunpack.c.l.bf16 %v78_v20  ;;  %v190_v31 = vld [vmem:[%s595_s4] sm:$0x1]  ;;  %p466_p10 = scmp.ne.s32.totalorder %s292_s8, %s465_s2  ;;  %p471_p12 = scmp.lt.s32.totalorder %s465_s2, %s465_s2 }
  0x3f   :  { %v191_v32 = vunpack.c.l.bf16 %v190_v31 }
  0x40   :  { %v83_v23 = vrot.slane %v79_v21, %v82_v22  ;;  %p472_p13 = por %p471_p12, %p470_p11 }
  0x41   :  { %340 = vmatpush3.bf16.msra.mxu0 %v385_v3  ;;  %360 = vmatpush3.bf16.msra.mxu1 %v393_v8  ;;  %v195_v33 = vrot.slane %v191_v32, %v82_v22 }
  0x42   :  { %341 = vmatprep.subr.bf16.mxu0 %v498_v0  ;;  %361 = vmatprep.subr.bf16.mxu1 %v498_v0  ;;  %p473_p0 = pnand %p472_p13, %p466_p10 }
  0x45   :  { %342 = vmatpush3.bf16.msra.mxu0 %v386_v5  ;;  %362 = vmatpush3.bf16.msra.mxu1 %v394_v10 }
  0x46   :  { %343 = vmatprep.subr.bf16.mxu0 %v498_v0  ;;  %363 = vmatprep.subr.bf16.mxu1 %v498_v0 }
  0x49   :  { %344 = vmatpush3.bf16.msra.mxu0 %v387_v7  ;;  %364 = vmatpush3.bf16.msra.mxu1 %v395_v12 }
  0x4a   :  { %345 = vmatprep.subr.bf16.mxu0 %v498_v0  ;;  %365 = vmatprep.subr.bf16.mxu1 %v498_v0 }
  0x4d   :  { %346 = vmatpush3.bf16.msra.mxu0 %v388_v9  ;;  %366 = vmatpush3.bf16.msra.mxu1 %v396_v14 }
  0x4e   :  { %347 = vmatprep.subr.bf16.mxu0 %v498_v0  ;;  %367 = vmatprep.subr.bf16.mxu1 %v498_v0 }
  0x51   :  { %348 = vmatpush3.bf16.msra.mxu0 %v389_v11  ;;  %368 = vmatpush3.bf16.msra.mxu1 %v397_v16 }
  0x52   :  { %349 = vmatprep.subr.bf16.mxu0 %v498_v0  ;;  %369 = vmatprep.subr.bf16.mxu1 %v498_v0 }
  0x55   :  { %350 = vmatpush3.bf16.msra.mxu0 %v390_v13  ;;  %370 = vmatpush3.bf16.msra.mxu1 %v398_v17 }
  0x58   :  { %352 = vmatmul.mubr.bf16.vlgmr.msra.gmra.mrb[0].mxu0 %v61_v15 }
 0x12b   :  { %v166_v24 = vpop.f32.mrb[0].mxu0 }
 0x12c   :  { %v167_v25 = vadd.f32 %v166_v24, %v83_v23  ;;  %v353_v26 = vpop.f32.mrb[1].mxu0 }
 0x12d   :  { %v169_v27 = vpop.f32.mrb[2].mxu0 }
 0x12e   :  { %v172_v28 = vmax.f32 %v167_v25, 0.0  ;;  %v354_v29 = vpop.f32.mrb[3].mxu0 }
 0x130   :  { %v173_v30 = vpack.c.bf16 %v172_v28, %v172_v28 }
 0x132   :  { %372 = vmatmul.mubr.bf16.vlgmr.msra.gmra.mrb[0].mxu1 %v173_v30 }
 0x205   :  { %v278_v34 = vpop.f32.mrb[0].mxu1 }
 0x206   :  { %v279_v35 = vadd.f32 %v278_v34, %v195_v33  ;;  %v373_v36 = vpop.f32.mrb[1].mxu1 }
 0x207   :  { %v281_v37 = vpop.f32.mrb[2].mxu1 }
 0x208   :  { %284 = vst [vmem:[#allocation8] sm:$0xff] %v279_v35  ;;  %v374_v38 = vpop.f32.mrb[3].mxu1 }
 0x209   :  { %476 = shalt.err (!%p473_p0)
}
 0x20a   :  { %s477_s10 = scalar_lea.hbm %s596_s5, 128 }
 0x20b   :  { %p478_p1 = scmp.ne.s32.totalorder %s596_s5, %s477_s10  ;;  %p481_p2 = scmp.lt.u32.totalorder %s477_s10, %s596_s5 }
 0x20d   :  { %p483_p3 = pnand %p481_p2, %p478_p1 }
 0x20f   :  { %486 = shalt.err (!%p483_p3)
}
 0x210   :  { %294 = dma.vmem_to_hbm [thread:$0]  %s292_s8, 128, %s596_s5, [#allocation4]  }
 0x211   :  { %491 = dma.done.wait [#allocation4], 128  }
 0x212   :  { %492 = vsyncadd [#allocation4], 4294967168 }
 0x213   :  { %298 = vsyncpa [#allocation3], 1 }
 0x214   :  { %299 = vsyncpa [#allocation6], 1 }
 0x215   :  { %300 = vsyncpa [#allocation4], 1 }

</bundles_post_ra>
